<compile_context>
chip_gen: v6e
topology: v6e:2x2x1
jax: 0.10.0
libtpu: 0.0.40
codegen_flags: <defaults>
</compile_context>

<pallas_src>
import jax
import jax.numpy as jnp
from jax import lax
from jax.experimental import pallas as pl
from jax.experimental.pallas import tpu as pltpu

BN_EPS = 1e-5


# ----------------------------------------------------------------------------- helpers
def _bn_relu(h, gb):
    """Training-mode BatchNorm1d (batch stats, biased var, one-pass) + ReLU on (N, tH) f32."""
    inv_n = 1.0 / h.shape[0]
    mean = jnp.sum(h, axis=0, keepdims=True) * inv_n            # (1, tH)
    mean_sq = jnp.sum(h * h, axis=0, keepdims=True) * inv_n     # (1, tH)
    var = jnp.maximum(mean_sq - mean * mean, 0.0)
    scale = gb[0:1, :] * lax.rsqrt(var + BN_EPS)                # rsqrt -> EUP slot
    shift = gb[1:2, :] - mean * scale
    return jnp.maximum(h * scale + shift, 0.0)                  # 2 VPU ops + max on (N, tH)


def _pad_to_128(p):
    return ((p + 127) // 128) * 128


def _pick_tile(dim):
    # Prefer 512/256-wide tiles (v6e/v7x MXU is 256 wide); 128 still saturates v5e.
    for t in (512, 256, 128):
        if dim % t == 0:
            return t
    return dim


def _vmem_limit(buf_bytes):
    # Per-generation cap: ~3/4 of physical VMEM (v5e/v6e 128 MiB -> 96 MiB, v7x 64 MiB -> 48 MiB).
    try:
        phys = getattr(pltpu.get_tpu_info(), "vmem_capacity_bytes", 64 << 20)
    except Exception:
        phys = 64 << 20
    cap = (phys * 3) // 4
    return int(min(max(2 * buf_bytes + (2 << 20), 4 << 20), cap))


def _prep_head_params(w1, gamma, beta, w2, b2, p_pad, mxu_dtype):
    p = w2.shape[1]
    w1c = w1.astype(mxu_dtype)
    gb = jnp.stack([gamma, beta], axis=0).astype(jnp.float32)             # (2, H) packed
    w2c = jnp.pad(w2.astype(mxu_dtype), ((0, 0), (0, p_pad - p)))         # lane-dense output
    b2p = jnp.pad(b2.astype(jnp.float32), (0, p_pad - p)).reshape(1, p_pad)
    return w1c, gb, w2c, b2p


# ----------------------------------------------------------------------------- kernels
def _head_kernel(x_ref, w1_ref, gb_ref, w2_ref, b2_ref, o_ref, acc_ref):
    """One H-tile of: Linear1 -> BN(train) -> ReLU, accumulated into Linear2's (N, tP) output."""
    k = pl.program_id(1)                      # H-tile index ("arbitrary" reduction axis)

    @pl.when(k == 0)
    def _():
        # Accumulator starts at b2 (saves the epilogue (N, tP) add).
        acc_ref[...] = jnp.broadcast_to(b2_ref[...], acc_ref.shape)

    h = jnp.dot(x_ref[...], w1_ref[...], preferred_element_type=jnp.float32)   # (N, tH) f32
    h = _bn_relu(h, gb_ref[...])
    acc_ref[...] += jnp.dot(h.astype(w2_ref.dtype), w2_ref[...],
                            preferred_element_type=jnp.float32)

    @pl.when(k == pl.num_programs(1) - 1)
    def _():
        o_ref[...] = acc_ref[...].astype(o_ref.dtype)


def _fused_heads_kernel(x_ref, w1a_ref, gba_ref, w2a_ref, b2a_ref,
                        w1b_ref, gbb_ref, w2b_ref, b2b_ref,
                        o_ref, proj_ref):
    """Projector head tiled over H; predictor head runs on the VMEM-resident projection
    in the final grid step (no HBM round trip for the (N, P) intermediate)."""
    k = pl.program_id(0)

    @pl.when(k == 0)
    def _():
        proj_ref[...] = jnp.broadcast_to(b2a_ref[...], proj_ref.shape)

    h = jnp.dot(x_ref[...], w1a_ref[...], preferred_element_type=jnp.float32)
    h = _bn_relu(h, gba_ref[...])
    proj_ref[...] += jnp.dot(h.astype(w2a_ref.dtype), w2a_ref[...],
                             preferred_element_type=jnp.float32)

    @pl.when(k == pl.num_programs(0) - 1)
    def _():
        # Predictor head on the completed projection (kept in VMEM).
        hb = jnp.dot(proj_ref[...].astype(w1b_ref.dtype), w1b_ref[...],
                     preferred_element_type=jnp.float32)
        hb = _bn_relu(hb, gbb_ref[...])
        y = jnp.dot(hb.astype(w2b_ref.dtype), w2b_ref[...],
                    preferred_element_type=jnp.float32) + b2b_ref[...]
        o_ref[...] = y.astype(o_ref.dtype)


# ----------------------------------------------------------------------------- wrappers
def projection_network(x, w1, b1, gamma, beta, w2, b2, *,
                       mxu_dtype=jnp.bfloat16, h_tile=None, p_tile=None):
    """Linear(D->H) -> BatchNorm1d(H, training) -> ReLU -> Linear(H->P). Returns (N, P) f32.

    Serves both ProjectionNetwork and PredictionNetwork of BYOLAudio (same structure).
    Gridded over (P-tiles "parallel", H-tiles "arbitrary") with an (N, tP) f32 accumulator.
    """
    del b1  # Linear-1 bias is exactly cancelled by the batch-stats BN that follows.

    n, d = x.shape
    h_dim = w1.shape[1]
    p = w2.shape[1]
    p_pad = _pad_to_128(p)

    th = h_tile or _pick_tile(h_dim)
    tp = p_tile or _pick_tile(p_pad)
    assert h_dim % th == 0 and p_pad % tp == 0

    xc = x.astype(mxu_dtype)                       # halve the dominant (N, D) input DMA
    w1c, gb, w2c, b2p = _prep_head_params(w1, gamma, beta, w2, b2, p_pad, mxu_dtype)

    ib = jnp.dtype(mxu_dtype).itemsize
    buf_bytes = (n * d * ib                              # x (resident)
                 + 2 * d * th * ib + 2 * 2 * th * 4      # w1 / gamma-beta tiles (double-buffered)
                 + 2 * th * tp * ib + 2 * tp * 4         # w2 / b2 tiles
                 + 2 * n * tp * 4 + n * tp * 4           # output + accumulator
                 + 3 * n * th * 4)                       # f32 elementwise temps

    out = pl.pallas_call(
        _head_kernel,
        out_shape=jax.ShapeDtypeStruct((n, p_pad), jnp.float32),
        grid_spec=pltpu.PrefetchScalarGridSpec(
            num_scalar_prefetch=0,
            grid=(p_pad // tp, h_dim // th),
            in_specs=[
                pl.BlockSpec((n, d), lambda j, k: (0, 0)),
                pl.BlockSpec((d, th), lambda j, k: (0, k)),
                pl.BlockSpec((2, th), lambda j, k: (0, k)),
                pl.BlockSpec((th, tp), lambda j, k: (k, j)),
                pl.BlockSpec((1, tp), lambda j, k: (0, j)),
            ],
            out_specs=pl.BlockSpec((n, tp), lambda j, k: (0, j)),
            scratch_shapes=[pltpu.VMEM((n, tp), jnp.float32)],
        ),
        compiler_params=pltpu.CompilerParams(
            dimension_semantics=("parallel", "arbitrary"),
            vmem_limit_bytes=_vmem_limit(buf_bytes),
        ),
    )(xc, w1c, gb, w2c, b2p)

    return out[:, :p] if p_pad != p else out


def projector_predictor(x, proj_params, pred_params, *,
                        mxu_dtype=jnp.bfloat16, h_tile=None):
    """BYOL online path: ProjectionNetwork followed by PredictionNetwork in ONE pallas_call.
    The (N, P) projection lives in a VMEM scratch accumulator across the grid; only the final
    prediction is written to HBM. Returns (N, P_pred) f32."""
    w1a, b1a, gamma_a, beta_a, w2a, b2a = proj_params
    w1b, b1b, gamma_b, beta_b, w2b, b2b = pred_params
    del b1a, b1b  # cancelled exactly by the batch-stats BN in each head

    n, d = x.shape
    ha = w1a.shape[1]
    pa = w2a.shape[1]
    hb = w1b.shape[1]
    pb = w2b.shape[1]
    pa_pad = _pad_to_128(pa)
    pb_pad = _pad_to_128(pb)

    th = h_tile or _pick_tile(ha)
    assert ha % th == 0

    xc = x.astype(mxu_dtype)
    w1ac, gba, w2ac, b2ap = _prep_head_params(w1a, gamma_a, beta_a, w2a, b2a, pa_pad, mxu_dtype)
    # Predictor Linear1: pad input dim to pa_pad with zero rows (padded projection columns are 0).
    w1bc = jnp.pad(w1b.astype(mxu_dtype), ((0, pa_pad - pa), (0, 0)))
    gbb = jnp.stack([gamma_b, beta_b], axis=0).astype(jnp.float32)
    w2bc = jnp.pad(w2b.astype(mxu_dtype), ((0, 0), (0, pb_pad - pb)))
    b2bp = jnp.pad(b2b.astype(jnp.float32), (0, pb_pad - pb)).reshape(1, pb_pad)

    ib = jnp.dtype(mxu_dtype).itemsize
    buf_bytes = (n * d * ib
                 + 2 * d * th * ib + 2 * 2 * th * 4
                 + 2 * th * pa_pad * ib + pa_pad * 4
                 + pa_pad * hb * ib + 2 * hb * 4 + hb * pb_pad * ib + pb_pad * 4
                 + n * pa_pad * 4                        # projection accumulator (scratch)
                 + 2 * n * pb_pad * 4                    # prediction output
                 + 3 * n * max(th, hb) * 4)              # f32 elementwise temps

    out = pl.pallas_call(
        _fused_heads_kernel,
        out_shape=jax.ShapeDtypeStruct((n, pb_pad), jnp.float32),
        grid_spec=pltpu.PrefetchScalarGridSpec(
            num_scalar_prefetch=0,
            grid=(ha // th,),
            in_specs=[
                pl.BlockSpec((n, d), lambda k: (0, 0)),
                pl.BlockSpec((d, th), lambda k: (0, k)),
                pl.BlockSpec((2, th), lambda k: (0, k)),
                pl.BlockSpec((th, pa_pad), lambda k: (k, 0)),
                pl.BlockSpec((1, pa_pad), lambda k: (0, 0)),
                pl.BlockSpec((pa_pad, hb), lambda k: (0, 0)),
                pl.BlockSpec((2, hb), lambda k: (0, 0)),
                pl.BlockSpec((hb, pb_pad), lambda k: (0, 0)),
                pl.BlockSpec((1, pb_pad), lambda k: (0, 0)),
            ],
            out_specs=pl.BlockSpec((n, pb_pad), lambda k: (0, 0)),
            scratch_shapes=[pltpu.VMEM((n, pa_pad), jnp.float32)],
        ),
        compiler_params=pltpu.CompilerParams(
            dimension_semantics=("arbitrary",),
            vmem_limit_bytes=_vmem_limit(buf_bytes),
        ),
    )(xc, w1ac, gba, w2ac, b2ap, w1bc, gbb, w2bc, b2bp)

    return out[:, :pb] if pb_pad != pb else out


# ----------------------------------------------------------------------------- reference
def _reference_head(x, w1, b1, gamma, beta, w2, b2, mxu_dtype=jnp.bfloat16):
    """Pure-JAX Linear->BN1d(train)->ReLU->Linear mirroring the bf16 MXU quantization."""
    q = lambda a: a.astype(mxu_dtype).astype(jnp.float32)
    h = q(x) @ q(w1) + b1          # b1 kept here: BN cancels it, demonstrating equivalence
    mean = h.mean(axis=0, keepdims=True)
    var = ((h - mean) ** 2).mean(axis=0, keepdims=True)
    h = (h - mean) / jnp.sqrt(var + BN_EPS)
    h = h * gamma + beta
    h = jnp.maximum(h, 0.0)
    return q(h) @ q(w2) + b2


if __name__ == "__main__":
    # Small but MXU-meaningful BYOL head shapes: batch 128, feature 64, hidden 256, projection 64.
    N, DIM, HID, PROJ = 128, 64, 256, 64

    key = jax.random.PRNGKey(0)
    kx, kw1, kb1, kw2, kb2, kw3, kb3, kw4, kb4 = jax.random.split(key, 9)

    x = jax.random.normal(kx, (N, DIM), dtype=jnp.float32)

    def linear_init(kw, kb, fan_in, fan_out):
        bound = 1.0 / jnp.sqrt(fan_in)
        w = jax.random.uniform(kw, (fan_in, fan_out), minval=-bound, maxval=bound,
                               dtype=jnp.float32)
        b = jax.random.uniform(kb, (fan_out,), minval=-bound, maxval=bound,
                               dtype=jnp.float32)
        return w, b

    # online_projector: Linear(DIM->HID) -> BN(HID) -> ReLU -> Linear(HID->PROJ)
    pw1, pb1 = linear_init(kw1, kb1, DIM, HID)
    pgamma, pbeta = jnp.ones((HID,), jnp.float32), jnp.zeros((HID,), jnp.float32)
    pw2, pb2 = linear_init(kw2, kb2, HID, PROJ)

    # online_predictor: Linear(PROJ->HID) -> BN(HID) -> ReLU -> Linear(HID->PROJ)
    qw1, qb1 = linear_init(kw3, kb3, PROJ, HID)
    qgamma, qbeta = jnp.ones((HID,), jnp.float32), jnp.zeros((HID,), jnp.float32)
    qw2, qb2 = linear_init(kw4, kb4, HID, PROJ)

    # Single gridded head (e.g. the target projector path). h_tile=128 forces >1 grid step so
    # the accumulator/pipeline path is actually exercised at these small shapes.
    proj = projection_network(x, pw1, pb1, pgamma, pbeta, pw2, pb2, h_tile=128)

    # Fused online path: projector + predictor in one pallas_call (no HBM round trip).
    pred = projector_predictor(
        x,
        (pw1, pb1, pgamma, pbeta, pw2, pb2),
        (qw1, qb1, qgamma, qbeta, qw2, qb2),
        h_tile=128)

    proj, pred = jax.block_until_ready((proj, pred))

    proj_ref = _reference_head(x, pw1, pb1, pgamma, pbeta, pw2, pb2)
    pred_ref = _reference_head(proj_ref, qw1, qb1, qgamma, qbeta, qw2, qb2)

    assert proj.shape == (N, PROJ) and pred.shape == (N, PROJ)
    assert jnp.allclose(proj, proj_ref, atol=5e-3, rtol=5e-3), "projector mismatch vs reference"
    assert jnp.allclose(pred, pred_ref, atol=1e-2, rtol=1e-2), \
        "fused projector+predictor mismatch vs reference"

    print("KERNEL_OK")
</pallas_src>

<mosaic_0001>
module attributes {stable_mosaic.version = 11 : i64} {
  func.func @_head_kernel(%arg0: i32, %arg1: i32, %arg2: memref<128x64xbf16, #tpu.memory_space<vmem>>, %arg3: memref<64x128xbf16, #tpu.memory_space<vmem>>, %arg4: memref<2x128xf32, #tpu.memory_space<vmem>>, %arg5: memref<128x128xbf16, #tpu.memory_space<vmem>>, %arg6: memref<1x128xf32, #tpu.memory_space<vmem>>, %arg7: memref<128x128xf32, #tpu.memory_space<vmem>>, %arg8: memref<128x128xf32, #tpu.memory_space<vmem>>) attributes {dimension_semantics = [#tpu.dimension_semantics<parallel>, #tpu.dimension_semantics<arbitrary>], iteration_bounds = array<i64: 1, 2>, scalar_prefetch = 0 : i64, scratch_operands = 1 : i64, tpu.core_type = #tpu.core_type<tc>, window_params = [{pipeline_mode = #tpu.pipeline_mode<synchronous>, transform_indices = @transform_0, window_bounds = array<i64: 128, 64>}, {transform_indices = @transform_1, window_bounds = array<i64: 64, 128>}, {transform_indices = @transform_2, window_bounds = array<i64: 2, 128>}, {transform_indices = @transform_3, window_bounds = array<i64: 128, 128>}, {transform_indices = @transform_4, window_bounds = array<i64: 1, 128>}, {transform_indices = @transform_5, window_bounds = array<i64: 128, 128>}]} {
    %c0_i32 = arith.constant 0 : i32
    %0 = arith.cmpi eq, %arg1, %c0_i32 : i32
    %1 = arith.extui %0 : i1 to i32
    %c0_i32_0 = arith.constant 0 : i32
    %2 = arith.cmpi ne, %1, %c0_i32_0 : i32
    scf.if %2 {
      %c0_21 = arith.constant 0 : index
      %c0_22 = arith.constant 0 : index
      %43 = vector.load %arg6[%c0_21, %c0_22] : memref<1x128xf32, #tpu.memory_space<vmem>>, vector<1x128xf32>
      %44 = vector.shape_cast %43 : vector<1x128xf32> to vector<1x128xf32>
      %45 = vector.broadcast %44 : vector<1x128xf32> to vector<128x128xf32>
      %c0_23 = arith.constant 0 : index
      %c0_24 = arith.constant 0 : index
      %46 = vector.load %arg8[%c0_23, %c0_24] : memref<128x128xf32, #tpu.memory_space<vmem>>, vector<128x128xf32>
      tpu.vector_store %arg8[%c0_23, %c0_24], %45 {strides = array<i32>} : memref<128x128xf32, #tpu.memory_space<vmem>>, vector<128x128xf32>,
    } else {
    }
    %c0 = arith.constant 0 : index
    %c0_1 = arith.constant 0 : index
    %3 = vector.load %arg2[%c0, %c0_1] : memref<128x64xbf16, #tpu.memory_space<vmem>>, vector<128x64xbf16>
    %c0_2 = arith.constant 0 : index
    %c0_3 = arith.constant 0 : index
    %4 = vector.load %arg3[%c0_2, %c0_3] : memref<64x128xbf16, #tpu.memory_space<vmem>>, vector<64x128xbf16>
    %cst = arith.constant dense<0.000000e+00> : vector<128x128xf32>
    %5 = tpu.matmul %3, %4, %cst {dimension_numbers = #tpu.dot_dimension_numbers<[1], [0], [0], [1], [0, 0, 1, 1], [], []>} : vector<128x64xbf16>, vector<64x128xbf16>, vector<128x128xf32> -> vector<128x128xf32>
    %c0_4 = arith.constant 0 : index
    %c0_5 = arith.constant 0 : index
    %6 = vector.load %arg4[%c0_4, %c0_5] : memref<2x128xf32, #tpu.memory_space<vmem>>, vector<2x128xf32>
    %cst_6 = arith.constant dense<0.000000e+00> : vector<128xf32>
    %7 = vector.multi_reduction <add>, %5, %cst_6 [0] : vector<128x128xf32> to vector<128xf32>
    %8 = vector.shape_cast %7 : vector<128xf32> to vector<1x128xf32>
    %cst_7 = arith.constant 7.812500e-03 : f32
    %9 = vector.broadcast %cst_7 : f32 to vector<1x128xf32>
    %10 = arith.mulf %8, %9 : vector<1x128xf32>
    %11 = arith.mulf %5, %5 : vector<128x128xf32>
    %cst_8 = arith.constant dense<0.000000e+00> : vector<128xf32>
    %12 = vector.multi_reduction <add>, %11, %cst_8 [0] : vector<128x128xf32> to vector<128xf32>
    %13 = vector.shape_cast %12 : vector<128xf32> to vector<1x128xf32>
    %cst_9 = arith.constant 7.812500e-03 : f32
    %14 = vector.broadcast %cst_9 : f32 to vector<1x128xf32>
    %15 = arith.mulf %13, %14 : vector<1x128xf32>
    %16 = arith.mulf %10, %10 : vector<1x128xf32>
    %17 = arith.subf %15, %16 : vector<1x128xf32>
    %cst_10 = arith.constant 0.000000e+00 : f32
    %18 = vector.broadcast %cst_10 : f32 to vector<1x128xf32>
    %19 = arith.maximumf %17, %18 : vector<1x128xf32>
    %20 = vector.extract_strided_slice %6 {offsets = [0, 0], sizes = [1, 128], strides = [1, 1]} : vector<2x128xf32> to vector<1x128xf32>
    %cst_11 = arith.constant 9.99999974E-6 : f32
    %21 = vector.broadcast %cst_11 : f32 to vector<1x128xf32>
    %22 = arith.addf %19, %21 : vector<1x128xf32>
    %23 = math.rsqrt %22 : vector<1x128xf32>
    %24 = arith.mulf %20, %23 : vector<1x128xf32>
    %25 = vector.extract_strided_slice %6 {offsets = [1, 0], sizes = [1, 128], strides = [1, 1]} : vector<2x128xf32> to vector<1x128xf32>
    %26 = arith.mulf %10, %24 : vector<1x128xf32>
    %27 = arith.subf %25, %26 : vector<1x128xf32>
    %28 = vector.broadcast %24 : vector<1x128xf32> to vector<128x128xf32>
    %29 = arith.mulf %5, %28 : vector<128x128xf32>
    %30 = vector.broadcast %27 : vector<1x128xf32> to vector<128x128xf32>
    %31 = arith.addf %29, %30 : vector<128x128xf32>
    %cst_12 = arith.constant 0.000000e+00 : f32
    %32 = vector.broadcast %cst_12 : f32 to vector<128x128xf32>
    %33 = arith.maximumf %31, %32 : vector<128x128xf32>
    %c0_13 = arith.constant 0 : index
    %c0_14 = arith.constant 0 : index
    %34 = vector.load %arg8[%c0_13, %c0_14] : memref<128x128xf32, #tpu.memory_space<vmem>>, vector<128x128xf32>
    %35 = arith.truncf %33 : vector<128x128xf32> to vector<128x128xbf16>
    %c0_15 = arith.constant 0 : index
    %c0_16 = arith.constant 0 : index
    %36 = vector.load %arg5[%c0_15, %c0_16] : memref<128x128xbf16, #tpu.memory_space<vmem>>, vector<128x128xbf16>
    %cst_17 = arith.constant dense<0.000000e+00> : vector<128x128xf32>
    %37 = tpu.matmul %35, %36, %cst_17 {dimension_numbers = #tpu.dot_dimension_numbers<[1], [0], [0], [1], [0, 0, 1, 1], [], []>} : vector<128x128xbf16>, vector<128x128xbf16>, vector<128x128xf32> -> vector<128x128xf32>
    %38 = arith.addf %34, %37 : vector<128x128xf32>
    %c0_18 = arith.constant 0 : index
    %c0_19 = arith.constant 0 : index
    %39 = vector.load %arg8[%c0_18, %c0_19] : memref<128x128xf32, #tpu.memory_space<vmem>>, vector<128x128xf32>
    tpu.vector_store %arg8[%c0_18, %c0_19], %38 {strides = array<i32>} : memref<128x128xf32, #tpu.memory_space<vmem>>, vector<128x128xf32>,
    %c1_i32 = arith.constant 1 : i32
    %40 = arith.cmpi eq, %arg1, %c1_i32 : i32
    %41 = arith.extui %40 : i1 to i32
    %c0_i32_20 = arith.constant 0 : i32
    %42 = arith.cmpi ne, %41, %c0_i32_20 : i32
    scf.if %42 {
      %c0_21 = arith.constant 0 : index
      %c0_22 = arith.constant 0 : index
      %43 = vector.load %arg8[%c0_21, %c0_22] : memref<128x128xf32, #tpu.memory_space<vmem>>, vector<128x128xf32>
      %c0_23 = arith.constant 0 : index
      %c0_24 = arith.constant 0 : index
      %44 = vector.load %arg7[%c0_23, %c0_24] : memref<128x128xf32, #tpu.memory_space<vmem>>, vector<128x128xf32>
      tpu.vector_store %arg7[%c0_23, %c0_24], %43 {strides = array<i32>} : memref<128x128xf32, #tpu.memory_space<vmem>>, vector<128x128xf32>,
    } else {
    }
    return
  }
  func.func @transform_0(%arg0: i32, %arg1: i32) -> (i32, i32) {
    %c0_i32 = arith.constant 0 : i32
    %c0_i32_0 = arith.constant 0 : i32
    %c0_i32_1 = arith.constant 0 : i32
    return %c0_i32, %c0_i32_0 : i32, i32
  }
  func.func @transform_1(%arg0: i32, %arg1: i32) -> (i32, i32) {
    %c0_i32 = arith.constant 0 : i32
    %c0_i32_0 = arith.constant 0 : i32
    return %c0_i32, %arg1 : i32, i32
  }
  func.func @transform_2(%arg0: i32, %arg1: i32) -> (i32, i32) {
    %c0_i32 = arith.constant 0 : i32
    %c0_i32_0 = arith.constant 0 : i32
    return %c0_i32, %arg1 : i32, i32
  }
  func.func @transform_3(%arg0: i32, %arg1: i32) -> (i32, i32) {
    %c0_i32 = arith.constant 0 : i32
    return %arg1, %arg0 : i32, i32
  }
  func.func @transform_4(%arg0: i32, %arg1: i32) -> (i32, i32) {
    %c0_i32 = arith.constant 0 : i32
    %c0_i32_0 = arith.constant 0 : i32
    return %c0_i32, %arg0 : i32, i32
  }
  func.func @transform_5(%arg0: i32, %arg1: i32) -> (i32, i32) {
    %c0_i32 = arith.constant 0 : i32
    %c0_i32_0 = arith.constant 0 : i32
    return %c0_i32, %arg0 : i32, i32
  }
}

</mosaic_0001>

<bundles_post_ra>
// kernel: tpu_custom_call.1
= control target key start
LH: loop header
LB: loop body
LE: loop exit
PB: predicated region body
PF: predicated region fallthrough
CT: control target
= control target key end

     0   :  { %10 = vsyncpa [#allocation5], 0  ;;  %s1745_s0 = inlined_call_operand.vmem [shape: bf16[128,64], index: 0, kind: input, shape index: {}]   ;;  %s1746_s1 = inlined_call_operand.vmem [shape: bf16[64,256], index: 1, kind: input, shape index: {}]   ;;  %s1747_s2 = inlined_call_operand.vmem [shape: f32[2,256], index: 2, kind: input, shape index: {}]   ;;  %s1748_s3 = inlined_call_operand.hbm [shape: bf16[256,128], index: 3, kind: input, shape index: {}]   ;;  %s1749_s4 = inlined_call_operand.vmem [shape: f32[1,128], index: 4, kind: input, shape index: {}]   ;;  %s1750_s5 = inlined_call_operand.hbm [shape: f32[128,128], index: 5, kind: output, shape index: {}]  }
   0x1   :  { %12 = vsyncpa [#allocation5 + $0x1], 0 }
   0x2   :  { %13 = vsyncpa [#allocation6], 0  ;;  %s1483_s18 = smov 0   ;;  %s1485_s19 = smov 0  }
   0x3   :  { %s1487_s20 = smov 0   ;;  %s1489_s21 = smov 0  }
   0x4   :  { %s1491_s22 = smov 0   ;;  %s1493_s23 = smov 0  }
   0x5 LB: > { %s1109_s24 = sadd.s32 4294967295, %s1445_s23   ;;  %s28_s25 = sadd.s32 1, %s1441_s22  ;;  %s1445_s23 = sphi %s1493_s23, %s19_s23   ;;  %s1441_s22 = sphi %s1491_s22, %s1758_s22   ;;  %s1437_s21 = sphi %s1489_s21, %s1757_s21   ;;  %s1433_s20 = sphi %s1487_s20, %s1756_s20   ;;  %s1429_s19 = sphi %s1485_s19, %s1755_s19   ;;  %s1425_s18 = sphi %s1483_s18, %s1754_s18  }
   0x6   : > { %p29_p0 = scmp.ge.s32.totalorder %s28_s25, 2  ;;  %s59_s26 = sadd.s32 1, %s1433_s20 }
   0x7   : > { %p66_p1 = scmp.ne.s32.totalorder %s1433_s20, %s1429_s19  ;;  %p67_p2 = scmp.eq.s32.totalorder %s1445_s23, 0 }
   0x8   : > { %s1760_s25 = smov (%p29_p0, %s28_s25), 0  ;;  %p126_p4 = scmp.ne.s32.totalorder %s1429_s19, %s1425_s18 }
   0x9   : > { %p1519_p3 = por %p67_p2, %p66_p1  ;;  %s56_s28 = ssub.s32 %s1441_s22, %s1760_s25 }
   0xa   : > { %p127_p5 = scmp.eq.s32.totalorder %s1109_s24, 0  ;;  %p57_p6 = scmp.eq.s32.totalorder %s56_s28, 0 }
   0xb   : > { %p1112_p8 = scmp.ge.s32.totalorder %s1445_s23, 2 }
   0xc   : > { %p1528_p7 = por %p127_p5, %p126_p4 }
   0xd   : > { %s1533_s30 = scalar_select %p57_p6, %s1433_s20, %s59_s26  }
   0xe   : > { %207 = sbr.rel (%p1112_p8) target bundleno = 44 (0x2c), region = 24 }
  0x13   : > { %210 = sbr.rel (!%p1519_p3) target bundleno = 28 (0x1c), region = 28  ;;  %s212_s6 = sand.u32 (%p1519_p3), 1, %s1433_s20  }
  0x14   : > { %s1114_s7 = sshll.u32 (%p1519_p3), %s1441_s22, 2  ;;  %s1113_s8 = sshll.u32 (%p1519_p3), %s212_s6, 5 }
  0x15   : > { %s216_s11 = scalar_lea.vmem (%p1519_p3), %s1746_s1, %s1114_s7  ;;  %s214_s12 = scalar_lea.vmem (%p1519_p3), [#allocation3], %s1113_s8 }
  0x16   : > { %v233_v0 = vld [vmem:[%s216_s11] sm:$0xf] (%p1519_p3)  ;;  %v235_v1 = vld [vmem:[%s216_s11 + $0x8] sm:$0xf] (%p1519_p3)  ;;  %v237_v2 = vld [vmem:[%s216_s11 + $0x10] sm:$0xf] (%p1519_p3) }
  0x17   : > { %234 = vst [vmem:[%s214_s12] sm:$0xf] (%p1519_p3), %v233_v0  ;;  %236 = vst [vmem:[%s214_s12 + $0x4] sm:$0xf] (%p1519_p3), %v235_v1  ;;  %v239_v3 = vld [vmem:[%s216_s11 + $0x18] sm:$0xf] (%p1519_p3) }
  0x18   : > { %v241_v4 = vld [vmem:[%s216_s11 + $0x20] sm:$0xf]  ;;  %238 = vst [vmem:[%s214_s12 + $0x8] sm:$0xf] %v237_v2  ;;  %240 = vst [vmem:[%s214_s12 + $0xc] sm:$0xf] %v239_v3 }
  0x19   : > { %242 = vst [vmem:[%s214_s12 + $0x10] sm:$0xf] %v241_v4  ;;  %v243_v5 = vld [vmem:[%s216_s11 + $0x28] sm:$0xf]  ;;  %v245_v6 = vld [vmem:[%s216_s11 + $0x30] sm:$0xf] }
  0x1a   : > { %v247_v7 = vld [vmem:[%s216_s11 + $0x38] sm:$0xf]  ;;  %244 = vst [vmem:[%s214_s12 + $0x14] sm:$0xf] %v243_v5  ;;  %246 = vst [vmem:[%s214_s12 + $0x18] sm:$0xf] %v245_v6 }
  0x1b   : > { %248 = vst [vmem:[%s214_s12 + $0x1c] sm:$0xf] %v247_v7 }
  0x1c PF: > { %s296_s13 = sand.u32 1, %s1433_s20   ;;  %s1157_s14 = sshll.u32 %s1441_s22, 10 }
  0x1d   : > { %s1115_s15 = sshll.u32 %s296_s13, 6  ;;  %s307_s18 = scalar_lea.hbm %s1748_s3, %s1157_s14 }
  0x1e   : > { %s300_s26 = scalar_lea.vmem [#allocation4], %s1115_s15  ;;  %s297_s6 = scalar_lea.sflag [#allocation5], %s296_s13 }
  0x1f   : > { %s308_s28 = sshll.u32 %s300_s26, 4  ;;  %s1447_s8 = smov [#allocation4]   ;;  %s309_s28 = int_to_ptr.vmem [resolvable:$true] %s308_s28 }
  0x20   : > { %s1353_s7 = scalar_lea.vmem %s309_s28, 1024  ;;  %s1357_s9 = sshll.u32 %s1447_s8, 4  ;;  %s1358_s9 = int_to_ptr.vmem [resolvable:$false] %s1357_s9 }
  0x21   : > { %p1354_p9 = scmp.ne.s32.totalorder %s309_s28, %s1353_s7  ;;  %s1359_s10 = scalar_lea.vmem %s1358_s9, 2048 }
  0x22   : > { %p1360_p12 = scmp.lt.s32.totalorder %s309_s28, %s1358_s9  ;;  %p1361_p13 = scmp.lt.s32.totalorder %s1359_s10, %s1353_s7 }
  0x23   : > { %p1355_p10 = pnand %p1354_p9, %p1519_p3 }
  0x24   : > { %p1362_p0 = por %p1361_p13, %p1360_p12 }
  0x25   : > { %p1356_p11 = pneg %p1355_p10 }
  0x27   : > { %p1363_p1 = pnand %p1362_p0, %p1356_p11 }
  0x29   : > { %1366 = shalt.err (!%p1363_p1)
}
  0x2a   : > { %s1448_s11 = smov 64   ;;  %s1449_s12 = smov 4  }
  0x2b   : > { %1258 = dma.hbm_to_vmem [thread:$0]  (%p1519_p3), %s307_s18, 1024, %s309_s28, %s297_s6, %s1448_s11, %s1448_s11, %s1449_s12  }
  0x2c PF: > { %p1118_p2 = scmp.ge.s32.totalorder %s1445_s23, 1  ;;  %p316_p4 = scmp.lt.s32.totalorder %s1445_s23, 3 }
  0x2e   : > { %p317_p5 = pnand %p1118_p2, %p316_p4 }
  0x2f   : > { %s323_s13 = sand.u32 (!%p317_p5), 1, %s1429_s19  }
  0x30   : > { %320 = sbr.rel (%p317_p5) target bundleno = 614 (0x266), region = 77  ;;  %s1119_s14 = sshll.u32 (!%p317_p5), %s323_s13, 5 }
  0x31   : > { %s1120_s15 = sshll.u32 (!%p317_p5), %s323_s13, 6  ;;  %s1555_s16 = scalar_lea.vmem (!%p317_p5), [#allocation3], %s1119_s14 }
  0x32   : > { %s330_s17 = scalar_lea.sflag (!%p317_p5), [#allocation5], %s323_s13  ;;  %s1557_s26 = scalar_lea.vmem (!%p317_p5), [#allocation4], %s1120_s15 }
  0x35   : > { %1416 = dma.done.wait (%p1528_p7), %s330_s17, 1024  }
  0x36   : > { %1418 = vsyncadd (%p1528_p7), %s330_s17, 4294966272  ;;  %p366_p3 = scmp.lt.s32.totalorder %s1437_s21, 1  ;;  %p1122_p6 = scmp.ne.s32.totalorder %s1437_s21, 0 }
  0x38   : > { %s367_s27 = scalar_select %p366_p3, %s1437_s21, 1 }
  0x39   : > { %378 = sbr.rel (%p1122_p6) target bundleno = 71 (0x47), region = 89 }
  0x3a   : > { %s1121_s18 = sshll.u32 %s367_s27, 1 }
  0x3b   : > { %s1568_s7 = scalar_lea.vmem %s1747_s2, %s1121_s18 }
  0x3e   : > { %v1123_v8 = vld [vmem:[%s1749_s4] ss:$0 sm:$0xff] }
  0x3f   : > { %386 = vst [vmem:[#allocation2 + $0x30] sm:$0xff] %v1123_v8  ;;  %387 = vst [vmem:[#allocation2] sm:$0xff] %v1123_v8 }
  0x40   : > { %388 = vst [vmem:[#allocation2 + $0x58] sm:$0xff] %v1123_v8  ;;  %389 = vst [vmem:[#allocation2 + $0x18] sm:$0xff] %v1123_v8 }
  0x41   : > { %390 = vst [vmem:[#allocation2 + $0x50] sm:$0xff] %v1123_v8  ;;  %391 = vst [vmem:[#allocation2 + $0x68] sm:$0xff] %v1123_v8 }
  0x42   : > { %392 = vst [vmem:[#allocation2 + $0x8] sm:$0xff] %v1123_v8  ;;  %393 = vst [vmem:[#allocation2 + $0x48] sm:$0xff] %v1123_v8 }
  0x43   : > { %394 = vst [vmem:[#allocation2 + $0x40] sm:$0xff] %v1123_v8  ;;  %395 = vst [vmem:[#allocation2 + $0x20] sm:$0xff] %v1123_v8 }
  0x44   : > { %396 = vst [vmem:[#allocation2 + $0x10] sm:$0xff] %v1123_v8  ;;  %397 = vst [vmem:[#allocation2 + $0x38] sm:$0xff] %v1123_v8 }
  0x45   : > { %398 = vst [vmem:[#allocation2 + $0x60] sm:$0xff] %v1123_v8  ;;  %399 = vst [vmem:[#allocation2 + $0x70] sm:$0xff] %v1123_v8 }
  0x46   : > { %400 = vst [vmem:[#allocation2 + $0x78] sm:$0xff] %v1123_v8  ;;  %401 = vst [vmem:[#allocation2 + $0x28] sm:$0xff] %v1123_v8 }
  0x47 PF: > { %v1319_v9 = vld [vmem:[%s1555_s16 + $0x18] sm:$0xff]   ;;  %v1320_v10 = vld [vmem:[%s1555_s16 + $0x10] sm:$0xff]   ;;  %v1321_v11 = vld [vmem:[%s1555_s16 + $0x8] sm:$0xff]   ;;  %vm490_vm0 = vcmask 523264   ;;  %p1152_p7 = scmp.ne.s32.totalorder %s1437_s21, 1 }
  0x48   : > { %1186 = vmatprep.subr.bf16.mxu0 %v1319_v9  ;;  %v1323_v12 = vld [vmem:[%s1745_s0] sm:$0xff]   ;;  %v1324_v14 = vld [vmem:[%s1745_s0 + $0x8] sm:$0xff]   ;;  %v1325_v15 = vld [vmem:[%s1745_s0 + $0x10] sm:$0xff]  }
  0x49   : > { %1187 = vmatpush3.bf16.msra.mxu0 %v1319_v9  ;;  %1194 = vmatprep.mubr.msk.bf16.mxu0 %vm490_vm0, %v1323_v12  ;;  %v1322_v13 = vld [vmem:[%s1555_s16] sm:$0xff]   ;;  %v1326_v16 = vld [vmem:[%s1745_s0 + $0x18] sm:$0xff]   ;;  %v1328_v18 = vld [vmem:[%s1745_s0 + $0x28] sm:$0xff]  }
  0x4a   : > { %1188 = vmatprep.subr.bf16.mxu0 %v1320_v10  ;;  %v1327_v17 = vld [vmem:[%s1745_s0 + $0x20] sm:$0xff]   ;;  %v1329_v19 = vld [vmem:[%s1745_s0 + $0x30] sm:$0xff]   ;;  %v1330_v20 = vld [vmem:[%s1745_s0 + $0x38] sm:$0xff]  }
  0x4b   : > { %v1331_v21 = vld [vmem:[%s1557_s26 + $0x38] sm:$0xff]   ;;  %v1332_v22 = vld [vmem:[%s1557_s26 + $0x30] sm:$0xff]   ;;  %v1333_v23 = vld [vmem:[%s1557_s26 + $0x28] sm:$0xff]  }
  0x4c   : > { %1242 = vmatprep.subr.bf16.mxu1 %v1331_v21  ;;  %v1334_v24 = vld [vmem:[%s1557_s26 + $0x20] sm:$0xff]   ;;  %v1335_v25 = vld [vmem:[%s1557_s26 + $0x18] sm:$0xff]   ;;  %v1336_v26 = vld [vmem:[%s1557_s26 + $0x10] sm:$0xff]  }
  0x4d   : > { %1189 = vmatpush3.bf16.msra.mxu0 %v1320_v10  ;;  %1250 = vmatpush3.bf16.msra.mxu1 %v1331_v21  ;;  %v1337_v27 = vld [vmem:[%s1557_s26 + $0x8] sm:$0xff]   ;;  %v1338_v28 = vld [vmem:[%s1557_s26] sm:$0xff]  }
  0x4e   : > { %1190 = vmatprep.subr.bf16.mxu0 %v1321_v11  ;;  %1243 = vmatprep.subr.bf16.mxu1 %v1332_v22 }
  0x51   : > { %1191 = vmatpush3.bf16.msra.mxu0 %v1321_v11  ;;  %1251 = vmatpush3.bf16.msra.mxu1 %v1332_v22 }
  0x52   : > { %1192 = vmatprep.subr.bf16.mxu0 %v1322_v13  ;;  %1244 = vmatprep.subr.bf16.mxu1 %v1333_v23 }
  0x55   : > { %1193 = vmatpush3.bf16.msra.mxu0 %v1322_v13  ;;  %1252 = vmatpush3.bf16.msra.mxu1 %v1333_v23 }
  0x56   : > { %1210 = vmatprep.subr.bf16.mxu0 %v1331_v21  ;;  %1245 = vmatprep.subr.bf16.mxu1 %v1334_v24 }
  0x58   : > { %1195 = vmatmul.mubr.msk.bf16.vlgmr.msra.gmra.mxu0 %vm490_vm0, %v1324_v14 }
  0x59   : > { %1198 = vmatprep.mubr.msk.bf16.mxu0 %vm490_vm0, %v1325_v15  ;;  %1211 = vmatpush3.bf16.msra.mxu0 %v1331_v21 }
  0x5a   : > { %1212 = vmatprep.subr.bf16.mxu0 %v1332_v22  ;;  %1253 = vmatpush3.bf16.msra.mxu1 %v1334_v24 }
  0x5b   : > { %1246 = vmatprep.subr.bf16.mxu1 %v1335_v25 }
  0x5d   : > { %1213 = vmatpush3.bf16.msra.mxu0 %v1332_v22 }
  0x5e   : > { %1214 = vmatprep.subr.bf16.mxu0 %v1333_v23  ;;  %1254 = vmatpush3.bf16.msra.mxu1 %v1335_v25 }
  0x5f   : > { %1247 = vmatprep.subr.bf16.mxu1 %v1336_v26 }
  0x60   : > { %1199 = vmatmul.mubr.msk.bf16.gmra.mxu0 %vm490_vm0, %v1326_v16 }
  0x61   : > { %1202 = vmatprep.mubr.msk.bf16.mxu0 %vm490_vm0, %v1327_v17  ;;  %1215 = vmatpush3.bf16.msra.mxu0 %v1333_v23 }
  0x62   : > { %1216 = vmatprep.subr.bf16.mxu0 %v1334_v24  ;;  %1255 = vmatpush3.bf16.msra.mxu1 %v1336_v26 }
  0x63   : > { %1248 = vmatprep.subr.bf16.mxu1 %v1337_v27 }
  0x65   : > { %1217 = vmatpush3.bf16.msra.mxu0 %v1334_v24 }
  0x66   : > { %1218 = vmatprep.subr.bf16.mxu0 %v1335_v25  ;;  %1256 = vmatpush3.bf16.msra.mxu1 %v1337_v27 }
  0x67   : > { %1249 = vmatprep.subr.bf16.mxu1 %v1338_v28 }
  0x68   : > { %1203 = vmatmul.mubr.msk.bf16.gmra.mxu0 %vm490_vm0, %v1328_v18 }
  0x69   : > { %1206 = vmatprep.mubr.msk.bf16.mxu0 %vm490_vm0, %v1329_v19  ;;  %1219 = vmatpush3.bf16.msra.mxu0 %v1335_v25 }
  0x6a   : > { %1220 = vmatprep.subr.bf16.mxu0 %v1336_v26  ;;  %1257 = vmatpush3.bf16.msra.mxu1 %v1338_v28 }
  0x6d   : > { %1221 = vmatpush3.bf16.msra.mxu0 %v1336_v26 }
  0x6e   : > { %1222 = vmatprep.subr.bf16.mxu0 %v1337_v27 }
  0x70   : > { %1207 = vmatmul.mubr.msk.bf16.gmra.mxu0 %vm490_vm0, %v1330_v20 }
  0x71   : > { %1223 = vmatpush3.bf16.msra.mxu0 %v1337_v27 }
  0x72   : > { %1224 = vmatprep.subr.bf16.mxu0 %v1338_v28 }
  0x75   : > { %1225 = vmatpush3.bf16.msra.mxu0 %v1338_v28 }
 0x118   : > { %v1618_v29 = vpop.f32.mrf.mxu0 }
 0x119   : > { %v637_v37 = vmul.f32 %v1618_v29, %v1618_v29 }
 0x11a   : > { %v1620_v30 = vpop.f32.mrf.mxu0 }
 0x11b   : > { %v635_v33 = vmul.f32 %v1620_v30, %v1620_v30 }
 0x11c   : > { %v1622_v31 = vpop.f32.mrf.mxu0 }
 0x11d   : > { %v638_v41 = vmul.f32 %v1622_v31, %v1622_v31 }
 0x11e   : > { %v1624_v32 = vpop.f32.mrf.mxu0 }
 0x11f   : > { %v613_v34 = vadd.f32 %v1624_v32, %v1620_v30  ;;  %v636_v35 = vmul.f32 %v1624_v32, %v1624_v32 }
 0x120   : > { %v1632_v36 = vpop.f32.mrf.mxu0 }
 0x121   : > { %v614_v38 = vadd.f32 %v1618_v29, %v613_v34  ;;  %v651_v39 = vadd.f32 %v636_v35, %v635_v33  ;;  %v641_v53 = vmul.f32 %v1632_v36, %v1632_v36 }
 0x122   : > { %v1637_v40 = vpop.f32.mrf.mxu0 }
 0x123   : > { %v652_v42 = vadd.f32 %v651_v39, %v637_v37  ;;  %v615_v43 = vadd.f32 %v1622_v31, %v614_v38  ;;  %v639_v46 = vmul.f32 %v1637_v40, %v1637_v40 }
 0x124   : > { %v1642_v44 = vpop.f32.mrf.mxu0 }
 0x125   : > { %v616_v45 = vadd.f32 %v615_v43, %v1637_v40  ;;  %v653_v47 = vadd.f32 %v652_v42, %v638_v41  ;;  %v642_v57 = vmul.f32 %v1642_v44, %v1642_v44 }
 0x126   : > { %v1647_v48 = vpop.f32.mrf.mxu0 }
 0x127   : > { %v654_v49 = vadd.f32 %v653_v47, %v639_v46  ;;  %v617_v50 = vadd.f32 %v616_v45, %v1647_v48  ;;  %v640_v51 = vmul.f32 %v1647_v48, %v1647_v48 }
 0x128   : > { %v1652_v52 = vpop.f32.mrf.mxu0 }
 0x129   : > { %v618_v54 = vadd.f32 %v1632_v36, %v617_v50  ;;  %v655_v55 = vadd.f32 %v654_v49, %v640_v51  ;;  %v645_v5 = vmul.f32 %v1652_v52, %v1652_v52 }
 0x12a   : > { %v1657_v56 = vpop.f32.mrf.mxu0 }
 0x12b   : > { %v656_v58 = vadd.f32 %v655_v55, %v641_v53  ;;  %v619_v59 = vadd.f32 %v1642_v44, %v618_v54  ;;  %v643_v62 = vmul.f32 %v1657_v56, %v1657_v56  ;;  %v684_v54 = vlaneseq }
 0x12c   : > { %v1662_v60 = vpop.f32.mrf.mxu0 }
 0x12d   : > { %v620_v61 = vadd.f32 %v619_v59, %v1657_v56  ;;  %v657_v63 = vadd.f32 %v656_v58, %v642_v57  ;;  %v646_v9 = vmul.f32 %v1662_v60, %v1662_v60  ;;  %v685_v55 = vshrl.u32 %v684_v54, 7  ;;  %v612_v57 = vld [vmem:[%s1568_s7] sm:$0x3] }
 0x12e   : > { %v1667_v0 = vpop.f32.mrf.mxu0 }
 0x12f   : > { %v658_v1 = vadd.f32 %v657_v63, %v643_v62  ;;  %v621_v2 = vadd.f32 %v620_v61, %v1667_v0  ;;  %v644_v3 = vmul.f32 %v1667_v0, %v1667_v0  ;;  %v686_v58 = vsub.s32 0, %v685_v55 }
 0x130   : > { %v1672_v4 = vpop.f32.mrf.mxu0 }
 0x131   : > { %v622_v6 = vadd.f32 %v1652_v52, %v621_v2  ;;  %v659_v7 = vadd.f32 %v658_v1, %v644_v3  ;;  %v649_v20 = vmul.f32 %v1672_v4, %v1672_v4  ;;  %v706_v2 = vsub.s32 1, %v685_v55 }
 0x132   : > { %v1677_v8 = vpop.f32.mrf.mxu0 }
 0x133   : > { %v660_v10 = vadd.f32 %v659_v7, %v645_v5  ;;  %v623_v11 = vadd.f32 %v1662_v60, %v622_v6  ;;  %v647_v14 = vmul.f32 %v1677_v8, %v1677_v8 }
 0x134   : > { %v1682_v12 = vpop.f32.mrf.mxu0 }
 0x135   : > { %v624_v13 = vadd.f32 %v623_v11, %v1677_v8  ;;  %v661_v15 = vadd.f32 %v660_v10, %v646_v9  ;;  %v650_v23 = vmul.f32 %v1682_v12, %v1682_v12 }
 0x136   : > { %v600_v16 = vpop.f32.mrf.mxu0 }
 0x137   : > { %v662_v17 = vadd.f32 %v661_v15, %v647_v14  ;;  %v625_v18 = vadd.f32 %v624_v13, %v600_v16  ;;  %v648_v19 = vmul.f32 %v600_v16, %v600_v16 }
 0x139   : > { %v626_v21 = vadd.f32 %v1672_v4, %v625_v18  ;;  %v663_v22 = vadd.f32 %v662_v17, %v648_v19 }
 0x13b   : > { %v627_v24 = vadd.f32 %v1682_v12, %v626_v21  ;;  %v664_v25 = vadd.f32 %v663_v22, %v649_v20 }
 0x13d   : > { %v628_v26 = vrot.slane %v627_v24, 4  ;;  %v665_v27 = vadd.f32 %v664_v25, %v650_v23 }
 0x13f   : > { %v629_v28 = vadd.f32 %v628_v26, %v627_v24  ;;  %v666_v33 = vrot.slane %v665_v27, 4 }
 0x141   : > { %v630_v34 = vrot.slane %v629_v28, 2  ;;  %v667_v35 = vadd.f32 %v666_v33, %v665_v27 }
 0x143   : > { %v631_v37 = vadd.f32 %v630_v34, %v629_v28  ;;  %v668_v38 = vrot.slane %v667_v35, 2 }
 0x145   : > { %v632_v39 = vrot.slane %v631_v37, 1  ;;  %v669_v41 = vadd.f32 %v668_v38, %v667_v35 }
 0x147   : > { %v633_v42 = vadd.f32 %v632_v39, %v631_v37  ;;  %v670_v43 = vrot.slane %v669_v41, 1 }
 0x149   : > { %v634_v45 = vmul.f32 0.0078125, %v633_v42  ;;  %v671_v46 = vadd.f32 %v670_v43, %v669_v41 }
 0x14b   : > { %v672_v47 = vmul.f32 0.0078125, %v671_v46  ;;  %v673_v49 = vmul.f32 %v634_v45, %v634_v45 }
 0x14d   : > { %v674_v50 = vsub.f32 %v672_v47, %v673_v49 }
 0x14f   : > { %v675_v51 = vmax.f32 %v674_v50, 0.0 }
 0x151   : > { %v676_v53 = vadd.f32 1e-05, %v675_v51 }
 0x153   : > { %1339 = vrsqrt.f32 %v676_v53 }
 0x160   : > { %v1340_v59 = vpop.eup %1339 }
 0x161   : > { %v678_v61 = vmul.f32 %v1340_v59, %v612_v57  ;;  %v742_v59 = vld [vmem:[#allocation2 + $0x58] sm:$0xff] }
 0x163   : > { %v679_v62 = vmul.f32 %v678_v61, %v634_v45  ;;  %v687_v63 = vrot.slane %v678_v61, %v686_v58  ;;  %v746_v61 = vld [vmem:[#allocation2 + $0x8] sm:$0xff] }
 0x165   : > { %v681_v1 = vrot.slane %v679_v62, 7  ;;  %v701_v3 = vmul.f32 %v687_v63, %v600_v16  ;;  %v688_v6 = vmul.f32 %v687_v63, %v1620_v30  ;;  %v689_v7 = vmul.f32 %v687_v63, %v1624_v32 }
 0x166   : > { %v692_v9 = vmul.f32 %v687_v63, %v1637_v40  ;;  %v693_v10 = vmul.f32 %v687_v63, %v1647_v48  ;;  %v690_v11 = vmul.f32 %v1618_v29, %v687_v63  ;;  %v691_v13 = vmul.f32 %v1622_v31, %v687_v63 }
 0x167   : > { %v683_v5 = vsub.f32 %v612_v57, %v681_v1  ;;  %v694_v14 = vmul.f32 %v1632_v36, %v687_v63  ;;  %v695_v17 = vmul.f32 %v1642_v44, %v687_v63  ;;  %v696_v16 = vmul.f32 %v687_v63, %v1657_v56 }
 0x168   : > { %v697_v18 = vmul.f32 %v687_v63, %v1667_v0  ;;  %v698_v30 = vmul.f32 %v1652_v52, %v687_v63  ;;  %v699_v32 = vmul.f32 %v1662_v60, %v687_v63  ;;  %v700_v40 = vmul.f32 %v687_v63, %v1677_v8 }
 0x169   : > { %v707_v15 = vrot.slane %v683_v5, %v706_v2  ;;  %v702_v48 = vmul.f32 %v1672_v4, %v687_v63  ;;  %v703_v36 = vmul.f32 %v1682_v12, %v687_v63  ;;  %v740_v63 = vld [vmem:[#allocation2 + $0x30] sm:$0xff] }
 0x16b   : > { %v708_v29 = vadd.f32 %v707_v15, %v688_v6  ;;  %v709_v19 = vadd.f32 %v707_v15, %v689_v7  ;;  %v712_v31 = vadd.f32 %v707_v15, %v692_v9  ;;  %v713_v20 = vadd.f32 %v707_v15, %v693_v10  ;;  %v743_v7 = vld [vmem:[#allocation2 + $0x18] sm:$0xff] }
 0x16c   : > { %v710_v21 = vadd.f32 %v707_v15, %v690_v11  ;;  %v711_v44 = vadd.f32 %v707_v15, %v691_v13  ;;  %v714_v22 = vadd.f32 %v707_v15, %v694_v14  ;;  %v715_v24 = vadd.f32 %v707_v15, %v695_v17  ;;  %v747_v11 = vld [vmem:[#allocation2 + $0x48] sm:$0xff] }
 0x16d   : > { %v724_v56 = vmax.f32 %v708_v29, 0.0  ;;  %v725_v23 = vmax.f32 %v709_v19, 0.0  ;;  %v728_v0 = vmax.f32 %v712_v31, 0.0  ;;  %v729_v52 = vmax.f32 %v713_v20, 0.0  ;;  %v750_v29 = vld [vmem:[#allocation2 + $0x10] sm:$0xff] }
 0x16e   : > { %v726_v25 = vmax.f32 %v710_v21, 0.0  ;;  %v727_v60 = vmax.f32 %v711_v44, 0.0  ;;  %v730_v26 = vmax.f32 %v714_v22, 0.0  ;;  %v731_v27 = vmax.f32 %v715_v24, 0.0  ;;  %v751_v44 = vld [vmem:[#allocation2 + $0x38] sm:$0xff] }
 0x16f   : > { %v756_v8 = vpack.c.bf16 %v725_v23, %v724_v56  ;;  %v716_v4 = vadd.f32 %v707_v15, %v696_v16  ;;  %v717_v28 = vadd.f32 %v707_v15, %v697_v18  ;;  %v758_v33 = vpack.c.bf16 %v729_v52, %v728_v0  ;;  %v745_v18 = vld [vmem:[#allocation2 + $0x68] sm:$0xff]  ;;  %v749_v23 = vld [vmem:[#allocation2 + $0x20] sm:$0xff]  ;;  %v754_v52 = vld [vmem:[#allocation2 + $0x78] sm:$0xff] }
 0x170   : > { %v757_v34 = vpack.c.bf16 %v727_v60, %v726_v25  ;;  %v718_v35 = vadd.f32 %v707_v15, %v698_v30  ;;  %v719_v12 = vadd.f32 %v707_v15, %v699_v32  ;;  %v721_v37 = vadd.f32 %v707_v15, %v701_v3  ;;  %v744_v3 = vld [vmem:[#allocation2 + $0x50] sm:$0xff] }
 0x171   : > { %1226 = vmatprep.mubr.bf16.mxu0 %v756_v8  ;;  %v759_v38 = vpack.c.bf16 %v731_v27, %v730_v26  ;;  %v732_v39 = vmax.f32 %v716_v4, 0.0  ;;  %v733_v41 = vmax.f32 %v717_v28, 0.0  ;;  %1230 = vmatprep.mubr.bf16.mxu1 %v758_v33  ;;  %v720_v45 = vadd.f32 %v707_v15, %v700_v40  ;;  %v752_v26 = vld [vmem:[#allocation2 + $0x60] sm:$0xff]  ;;  %v755_v4 = vld [vmem:[#allocation2 + $0x28] sm:$0xff] }
 0x172   : > { %1227 = vmatmul.mubr.bf16.vlgmr.msra.gmra.mxu0 %v757_v34  ;;  %v734_v42 = vmax.f32 %v718_v35, 0.0  ;;  %v735_v43 = vmax.f32 %v719_v12, 0.0  ;;  %v722_v46 = vadd.f32 %v707_v15, %v702_v48  ;;  %v723_v49 = vadd.f32 %v707_v15, %v703_v36  ;;  %v741_v15 = vld [vmem:[#allocation2] sm:$0xff]  ;;  %v753_v34 = vld [vmem:[#allocation2 + $0x70] sm:$0xff] }
 0x173   : > { %1231 = vmatmul.mubr.bf16.vlgmr.msra.gmra.mxu1 %v759_v38  ;;  %v760_v47 = vpack.c.bf16 %v733_v41, %v732_v39  ;;  %v736_v54 = vmax.f32 %v720_v45, 0.0  ;;  %v737_v55 = vmax.f32 %v721_v37, 0.0  ;;  %v748_v36 = vld [vmem:[#allocation2 + $0x40] sm:$0xff] }
 0x174   : > { %v761_v50 = vpack.c.bf16 %v735_v43, %v734_v42  ;;  %v738_v51 = vmax.f32 %v722_v46, 0.0  ;;  %v739_v53 = vmax.f32 %v723_v49, 0.0 }
 0x175   : > { %1234 = vmatprep.mubr.bf16.mxu1 %v760_v47  ;;  %v762_v58 = vpack.c.bf16 %v737_v55, %v736_v54 }
 0x176   : > { %v763_v57 = vpack.c.bf16 %v739_v53, %v738_v51 }
 0x17b   : > { %1235 = vmatmul.mubr.bf16.gmra.mxu1 %v761_v50 }
 0x17c   : > { %1238 = vmatprep.mubr.bf16.mxu1 %v762_v58 }
 0x183   : > { %1239 = vmatmul.mubr.bf16.gmra.mxu1 %v763_v57 }
 0x232   : > { %v1228_v62 = vpop.f32.mrf.mxu0 }
 0x233   : > { %v927_v1 = vadd.f32 %v1228_v62, %v742_v59  ;;  %v1232_v2 = vpop.f32.mrf.mxu1 }
 0x234   : > { %v931_v5 = vadd.f32 %v1232_v2, %v746_v61  ;;  %v862_v6 = vpop.f32.mrf.mxu0 }
 0x235   : > { %943 = vst [vmem:[#allocation2 + $0x58] sm:$0xff] %v927_v1  ;;  %v925_v9 = vadd.f32 %v862_v6, %v740_v63  ;;  %v878_v10 = vpop.f32.mrf.mxu1 }
 0x236   : > { %947 = vst [vmem:[#allocation2 + $0x8] sm:$0xff] %v931_v5  ;;  %v929_v13 = vadd.f32 %v878_v10, %v744_v3  ;;  %v1229_v14 = vpop.f32.mrf.mxu0 }
 0x237   : > { %941 = vst [vmem:[#allocation2 + $0x30] sm:$0xff] %v925_v9  ;;  %v928_v17 = vadd.f32 %v1229_v14, %v743_v7  ;;  %v1233_v16 = vpop.f32.mrf.mxu1 }
 0x238   : > { %945 = vst [vmem:[#allocation2 + $0x50] sm:$0xff] %v929_v13  ;;  %v932_v30 = vadd.f32 %v1233_v16, %v747_v11  ;;  %v865_v32 = vpop.f32.mrf.mxu0 }
 0x239   : > { %944 = vst [vmem:[#allocation2 + $0x18] sm:$0xff] %v928_v17  ;;  %v926_v40 = vadd.f32 %v865_v32, %v741_v15  ;;  %v881_v48 = vpop.f32.mrf.mxu1 }
 0x23a   : > { %948 = vst [vmem:[#allocation2 + $0x48] sm:$0xff] %v932_v30  ;;  %v930_v19 = vadd.f32 %v881_v48, %v745_v18 }
 0x23b   : > { %942 = vst [vmem:[#allocation2] sm:$0xff] %v926_v40  ;;  %v1236_v31 = vpop.f32.mrf.mxu1 }
 0x23c   : > { %946 = vst [vmem:[#allocation2 + $0x68] sm:$0xff] %v930_v19  ;;  %v935_v20 = vadd.f32 %v1236_v31, %v750_v29 }
 0x23d   : > { %v894_v21 = vpop.f32.mrf.mxu1 }
 0x23e   : > { %951 = vst [vmem:[#allocation2 + $0x10] sm:$0xff] %v935_v20  ;;  %v933_v22 = vadd.f32 %v894_v21, %v748_v36 }
 0x23f   : > { %v1237_v56 = vpop.f32.mrf.mxu1 }
 0x240   : > { %949 = vst [vmem:[#allocation2 + $0x40] sm:$0xff] %v933_v22  ;;  %v936_v0 = vadd.f32 %v1237_v56, %v751_v44 }
 0x241   : > { %v897_v24 = vpop.f32.mrf.mxu1 }
 0x242   : > { %952 = vst [vmem:[#allocation2 + $0x38] sm:$0xff] %v936_v0  ;;  %v934_v25 = vadd.f32 %v897_v24, %v749_v23 }
 0x243   : > { %v1240_v60 = vpop.f32.mrf.mxu1 }
 0x244   : > { %950 = vst [vmem:[#allocation2 + $0x20] sm:$0xff] %v934_v25  ;;  %v939_v8 = vadd.f32 %v1240_v60, %v754_v52 }
 0x245   : > { %v910_v27 = vpop.f32.mrf.mxu1 }
 0x246   : > { %955 = vst [vmem:[#allocation2 + $0x78] sm:$0xff] %v939_v8  ;;  %v937_v28 = vadd.f32 %v910_v27, %v752_v26 }
 0x247   : > { %v1241_v33 = vpop.f32.mrf.mxu1 }
 0x248   : > { %953 = vst [vmem:[#allocation2 + $0x60] sm:$0xff] %v937_v28  ;;  %v940_v35 = vadd.f32 %v1241_v33, %v755_v4  ;;  %960 = sbr.rel (%p1152_p7) target bundleno = 598 (0x256), region = 93 }
 0x249   : > { %v913_v12 = vpop.f32.mrf.mxu1 }
 0x24a   : > { %956 = vst [vmem:[#allocation2 + $0x28] sm:$0xff] %v940_v35  ;;  %v938_v37 = vadd.f32 %v913_v12, %v753_v34 }
 0x24c   : > { %954 = vst [vmem:[#allocation2 + $0x70] sm:$0xff] %v938_v37 }
 0x24d   : > { %v961_v38 = vld [vmem:[#allocation2 + $0x30] sm:$0xff]  ;;  %v962_v39 = vld [vmem:[#allocation2] sm:$0xff]  ;;  %v963_v41 = vld [vmem:[#allocation2 + $0x58] sm:$0xff] }
 0x24e   : > { %977 = vst [vmem:[#allocation7] sm:$0xff] %v961_v38  ;;  %978 = vst [vmem:[#allocation7 + $0x8] sm:$0xff] %v962_v39  ;;  %v964_v42 = vld [vmem:[#allocation2 + $0x18] sm:$0xff]  ;;  %v965_v43 = vld [vmem:[#allocation2 + $0x50] sm:$0xff] }
 0x24f   : > { %979 = vst [vmem:[#allocation7 + $0x10] sm:$0xff] %v963_v41  ;;  %v966_v45 = vld [vmem:[#allocation2 + $0x68] sm:$0xff]  ;;  %980 = vst [vmem:[#allocation7 + $0x18] sm:$0xff] %v964_v42  ;;  %v969_v49 = vld [vmem:[#allocation2 + $0x40] sm:$0xff] }
 0x250   : > { %981 = vst [vmem:[#allocation7 + $0x20] sm:$0xff] %v965_v43  ;;  %982 = vst [vmem:[#allocation7 + $0x28] sm:$0xff] %v966_v45  ;;  %v967_v46 = vld [vmem:[#allocation2 + $0x8] sm:$0xff]  ;;  %v970_v50 = vld [vmem:[#allocation2 + $0x20] sm:$0xff] }
 0x251   : > { %v968_v47 = vld [vmem:[#allocation2 + $0x48] sm:$0xff]  ;;  %983 = vst [vmem:[#allocation7 + $0x30] sm:$0xff] %v967_v46  ;;  %985 = vst [vmem:[#allocation7 + $0x40] sm:$0xff] %v969_v49  ;;  %v971_v51 = vld [vmem:[#allocation2 + $0x10] sm:$0xff] }
 0x252   : > { %984 = vst [vmem:[#allocation7 + $0x38] sm:$0xff] %v968_v47  ;;  %v972_v53 = vld [vmem:[#allocation2 + $0x38] sm:$0xff]  ;;  %986 = vst [vmem:[#allocation7 + $0x48] sm:$0xff] %v970_v50  ;;  %v973_v54 = vld [vmem:[#allocation2 + $0x60] sm:$0xff] }
 0x253   : > { %987 = vst [vmem:[#allocation7 + $0x50] sm:$0xff] %v971_v51  ;;  %988 = vst [vmem:[#allocation7 + $0x58] sm:$0xff] %v972_v53  ;;  %v974_v55 = vld [vmem:[#allocation2 + $0x70] sm:$0xff]  ;;  %v975_v57 = vld [vmem:[#allocation2 + $0x78] sm:$0xff] }
 0x254   : > { %989 = vst [vmem:[#allocation7 + $0x60] sm:$0xff] %v973_v54  ;;  %990 = vst [vmem:[#allocation7 + $0x68] sm:$0xff] %v974_v55  ;;  %v976_v58 = vld [vmem:[#allocation2 + $0x28] sm:$0xff] }
 0x255   : > { %991 = vst [vmem:[#allocation7 + $0x70] sm:$0xff] %v975_v57  ;;  %992 = vst [vmem:[#allocation7 + $0x78] sm:$0xff] %v976_v58 }
 0x256 PF: > { %p1712_p8 = scmp.eq.s32.totalorder %s1109_s24, 1  ;;  %s1450_s26 = smov [#allocation7]  }
 0x257   : > { %s1001_s7 = sshll.u32 %s1450_s26, 4  ;;  %s1002_s7 = int_to_ptr.vmem [resolvable:$true] %s1001_s7 }
 0x258   : > { %s1367_s10 = scalar_lea.vmem %s1002_s7, 2048  ;;  %p1374_p12 = scmp.lt.s32.totalorder %s1002_s7, %s1002_s7 }
 0x259   : > { %p1368_p9 = scmp.ne.s32.totalorder %s1002_s7, %s1367_s10  ;;  %p1375_p13 = scmp.lt.s32.totalorder %s1367_s10, %s1367_s10 }
 0x25b   : > { %p1369_p10 = pnand %p1368_p9, %p1712_p8  ;;  %p1376_p0 = por %p1375_p13, %p1374_p12 }
 0x25d   : > { %p1370_p11 = pneg %p1369_p10 }
 0x25f   : > { %p1377_p1 = pnand %p1376_p0, %p1370_p11 }
 0x261   : > { %1380 = shalt.err (!%p1377_p1)
}
 0x262   : > { %s1451_s11 = smov 128   ;;  %s1452_s24 = smov 8  }
 0x263   : > { %1261 = dma.vmem_to_hbm [thread:$0]  (%p1712_p8), %s1002_s7, 2048, %s1750_s5, [#allocation6], %s1451_s11, %s1451_s11, %s1452_s24  }
 0x264   : > { %1420 = dma.done.wait (%p1712_p8), [#allocation6], 2048  }
 0x265   : > { %1422 = vsyncadd (%p1712_p8), [#allocation6], 4294965248 }
 0x266 PF: > { %s19_s23 = sadd.s32 1, %s1445_s23   ;;  %s1754_s18 = smov %s1429_s19 }
 0x267   : > { %p16_p2 = scmp.ge.s32.totalorder %s19_s23, 4   ;;  %s1755_s19 = smov %s1433_s20 }
 0x268   : > { %s1756_s20 = smov %s1533_s30  ;;  %s1757_s21 = smov %s1441_s22 }
 0x269   : > { %s1758_s22 = smov %s1760_s25  ;;  %18 = sbr.rel (!%p16_p2) target bundleno = 5 (0x5), region = 141 }
 0x26e   :  { %1017 = vsyncpa [#allocation5], 1 }
 0x26f   :  { %1019 = vsyncpa [#allocation5 + $0x1], 1 }
 0x270   :  { %1020 = vsyncpa [#allocation6], 1 }
 0x271   :  { %1022 = vsyncpa [#allocation6 + $0x1], 1 }

</bundles_post_ra>
